<compile_context>
chip_gen: v6e
topology: v6e:2x2x1
jax: 0.10.0
libtpu: 0.0.40
codegen_flags: <defaults>
</compile_context>

<pallas_src>
import jax
import jax.numpy as jnp
from jax.experimental import pallas as pl
from jax.experimental.pallas import tpu as pltpu

HIDDEN = 128


def _round_up(n, m):
    return ((n + m - 1) // m) * m


def _vmem_limit_bytes():
    """Generation-aware VMEM budget: ~64 MiB on v5e/v6e (128 MiB physical),
    ~32 MiB on v7x (64 MiB physical).  Conservative fallback if query fails."""
    try:
        phys = pltpu.get_tpu_info().vmem_capacity_bytes
        return int(min(phys // 2, 64 << 20))
    except Exception:
        return 32 << 20


def _largest_tile_dividing(b8, cap):
    """Largest multiple-of-8 tile <= cap that divides b8 (b8 % 8 == 0)."""
    n = b8 // 8
    cap_d = max(1, cap // 8)
    best = 1
    i = 1
    while i * i <= n:
        if n % i == 0:
            for d in (i, n // i):
                if d <= cap_d and d > best:
                    best = d
        i += 1
    return best * 8


def _choose_tiling(B, input_dim, head_n, max_tile, vmem_budget):
    """Pick the batch tile TB (multiple of 8) and the padded batch size."""
    b8 = _round_up(B, 8)
    # Double-buffered bf16 x and out tiles + resident weights must fit VMEM.
    bytes_per_row = 2 * input_dim * 2 + 2 * head_n * 2
    resident = (input_dim * HIDDEN + HIDDEN * head_n) * 2 + (HIDDEN + head_n) * 4
    cap = (int(vmem_budget * 0.8) - resident) // bytes_per_row
    cap = max(8, min(max_tile, (cap // 8) * 8))

    if b8 <= cap:
        if b8 > 1024:
            # Guarantee >= 2 parallel grid steps so v7x's 2nd TensorCore works.
            tb = _round_up(b8, 16) // 2
        else:
            tb = b8
    else:
        # Prefer a tile that divides b8 exactly -> no jnp.pad copy of x.
        tb = _largest_tile_dividing(b8, cap)
        if tb < max(128, cap // 4):
            tb = cap  # divisor too small; accept at most one padded tile
    return tb, _round_up(b8, tb)


def actor_critic_kernel(
    x_ref,    # (TB, input_dim)   bf16, tiled over batch
    w1_ref,   # (input_dim, 128)  bf16, VMEM-resident
    b1_ref,   # (1, 128)          f32,  resident
    wh_ref,   # (128, head_n)     bf16, fused [mu | value | zero-pad], resident
    bh_ref,   # (1, head_n)       f32,  fused head bias, resident
    out_ref,  # (TB, head_n)      bf16, lane-dense output slab
):
    # shared: Linear + ReLU  (bf16 MXU matmul, f32 accumulate, VPU max)
    h = jnp.dot(x_ref[...], w1_ref[...], preferred_element_type=jnp.float32)
    h = jnp.maximum(h + b1_ref[...], 0.0)
    # fused actor-mu / critic heads: one lane-dense MXU matmul + dense store
    out = (
        jnp.dot(h.astype(jnp.bfloat16), wh_ref[...],
                preferred_element_type=jnp.float32)
        + bh_ref[...]
    )
    out_ref[...] = out.astype(out_ref.dtype)


def prepare_params(params):
    """One-time param prep: fuse mu/value heads into a zero-padded lane-dense
    matrix and cast matmul weights to bf16.  Run once, reuse every forward."""
    input_dim, hidden = params["w1"].shape
    assert hidden == HIDDEN
    action_dim = params["wmu"].shape[1]
    head_n = _round_up(action_dim + 1, 128)   # mu columns + 1 value column
    assert action_dim + 1 <= head_n

    wh = jnp.zeros((HIDDEN, head_n), jnp.float32)
    wh = wh.at[:, :action_dim].set(params["wmu"])
    wh = wh.at[:, action_dim:action_dim + 1].set(params["wv"])
    bh = jnp.zeros((1, head_n), jnp.float32)
    bh = bh.at[:, :action_dim].set(params["bmu"])
    bh = bh.at[:, action_dim:action_dim + 1].set(params["bv"])

    return {
        "w1": params["w1"].astype(jnp.bfloat16),
        "b1": params["b1"].astype(jnp.float32),
        "wh": wh.astype(jnp.bfloat16),
        "bh": bh,
        "log_std": params["log_std"].astype(jnp.float32),
        "action_dim": action_dim,
        "input_dim": input_dim,
        "head_n": head_n,
    }


def actor_critic_forward(x, prepped, *, max_tile=2048):
    """x: (B, input_dim) float32/bfloat16.  prepped: output of prepare_params."""
    B, input_dim = x.shape
    assert input_dim == prepped["input_dim"]
    action_dim = prepped["action_dim"]
    head_n = prepped["head_n"]

    vmem_budget = _vmem_limit_bytes()
    TB, B_pad = _choose_tiling(B, input_dim, head_n, max_tile, vmem_budget)

    x_bf = x.astype(jnp.bfloat16)
    if B_pad != B:
        x_bf = jnp.pad(x_bf, ((0, B_pad - B), (0, 0)))
    grid = (B_pad // TB,)

    slab = pl.pallas_call(
        actor_critic_kernel,
        out_shape=jax.ShapeDtypeStruct((B_pad, head_n), jnp.bfloat16),
        grid=grid,
        in_specs=[
            pl.BlockSpec((TB, input_dim), lambda i: (i, 0)),      # x: batch-tiled
            pl.BlockSpec((input_dim, HIDDEN), lambda i: (0, 0)),   # w1: resident
            pl.BlockSpec((1, HIDDEN), lambda i: (0, 0)),           # b1: resident
            pl.BlockSpec((HIDDEN, head_n), lambda i: (0, 0)),      # fused head W
            pl.BlockSpec((1, head_n), lambda i: (0, 0)),           # fused head b
        ],
        out_specs=pl.BlockSpec((TB, head_n), lambda i: (i, 0)),
        compiler_params=pltpu.CompilerParams(
            dimension_semantics=("parallel",),   # shard batch grid across TCs
            vmem_limit_bytes=vmem_budget,
        ),
    )(x_bf, prepped["w1"], prepped["b1"], prepped["wh"], prepped["bh"])

    slab = slab[:B]
    mu = slab[:, :action_dim].astype(jnp.float32)
    value = slab[:, action_dim:action_dim + 1].astype(jnp.float32)
    # std is constant w.r.t. x — computed once outside the kernel, in f32.
    std = jnp.broadcast_to(jnp.exp(prepped["log_std"]), mu.shape)
    return mu, std, value


def init_params(key, input_dim, action_dim, hidden=HIDDEN):
    """Deterministic init mimicking nn.Linear's uniform(-1/sqrt(fan_in), ...)."""
    ks = jax.random.split(key, 6)

    def linear_init(kw, kb, fan_in, fan_out):
        bound = 1.0 / jnp.sqrt(fan_in)
        w = jax.random.uniform(kw, (fan_in, fan_out), jnp.float32, -bound, bound)
        b = jax.random.uniform(kb, (1, fan_out), jnp.float32, -bound, bound)
        return w, b

    w1, b1 = linear_init(ks[0], ks[1], input_dim, hidden)
    wmu, bmu = linear_init(ks[2], ks[3], hidden, action_dim)
    wv, bv = linear_init(ks[4], ks[5], hidden, 1)
    log_std = jnp.zeros((1, action_dim), jnp.float32)  # nn.Parameter(torch.zeros)
    return {
        "w1": w1, "b1": b1,
        "wmu": wmu, "bmu": bmu,
        "wv": wv, "bv": bv,
        "log_std": log_std,
    }


def reference_forward(x, params):
    h = jnp.maximum(x @ params["w1"] + params["b1"], 0.0)
    mu = h @ params["wmu"] + params["bmu"]
    std = jnp.broadcast_to(jnp.exp(params["log_std"]), mu.shape)
    val = h @ params["wv"] + params["bv"]
    return mu, std, val


if __name__ == "__main__":
    B, INPUT_DIM, ACTION_DIM = 2, 16, 4

    key = jax.random.PRNGKey(0)
    k_x, k_p = jax.random.split(key)
    x = jax.random.normal(k_x, (B, INPUT_DIM), jnp.float32)
    params = init_params(k_p, INPUT_DIM, ACTION_DIM)
    prepped = prepare_params(params)   # one-time packing + bf16 cast

    mu, std, value = jax.block_until_ready(actor_critic_forward(x, prepped))

    # sanity check against the pure-JAX f32 reference (bf16 operand tolerance)
    mu_r, std_r, val_r = reference_forward(x, params)
    assert mu.shape == (B, ACTION_DIM)
    assert std.shape == (B, ACTION_DIM)
    assert value.shape == (B, 1)
    assert jnp.allclose(mu, mu_r, rtol=2e-2, atol=2e-2)
    assert jnp.allclose(std, std_r, rtol=1e-5, atol=1e-6)
    assert jnp.allclose(value, val_r, rtol=2e-2, atol=2e-2)

    print("KERNEL_OK")
</pallas_src>

<mosaic_0001>
module attributes {stable_mosaic.version = 11 : i64} {
  func.func @actor_critic_kernel(%arg0: i32, %arg1: memref<8x16xbf16, #tpu.memory_space<vmem>>, %arg2: memref<16x128xbf16, #tpu.memory_space<vmem>>, %arg3: memref<1x128xf32, #tpu.memory_space<vmem>>, %arg4: memref<128x128xbf16, #tpu.memory_space<vmem>>, %arg5: memref<1x128xf32, #tpu.memory_space<vmem>>, %arg6: memref<8x128xbf16, #tpu.memory_space<vmem>>) attributes {dimension_semantics = [#tpu.dimension_semantics<parallel>], iteration_bounds = array<i64: 1>, scalar_prefetch = 0 : i64, scratch_operands = 0 : i64, tpu.core_type = #tpu.core_type<tc>, window_params = [{transform_indices = @transform_0, window_bounds = array<i64: 8, 16>}, {pipeline_mode = #tpu.pipeline_mode<synchronous>, transform_indices = @transform_1, window_bounds = array<i64: 16, 128>}, {pipeline_mode = #tpu.pipeline_mode<synchronous>, transform_indices = @transform_2, window_bounds = array<i64: 1, 128>}, {pipeline_mode = #tpu.pipeline_mode<synchronous>, transform_indices = @transform_3, window_bounds = array<i64: 128, 128>}, {pipeline_mode = #tpu.pipeline_mode<synchronous>, transform_indices = @transform_4, window_bounds = array<i64: 1, 128>}, {transform_indices = @transform_5, window_bounds = array<i64: 8, 128>}]} {
    %c0 = arith.constant 0 : index
    %c0_0 = arith.constant 0 : index
    %0 = vector.load %arg1[%c0, %c0_0] : memref<8x16xbf16, #tpu.memory_space<vmem>>, vector<8x16xbf16>
    %c0_1 = arith.constant 0 : index
    %c0_2 = arith.constant 0 : index
    %1 = vector.load %arg2[%c0_1, %c0_2] : memref<16x128xbf16, #tpu.memory_space<vmem>>, vector<16x128xbf16>
    %cst = arith.constant dense<0.000000e+00> : vector<8x128xf32>
    %2 = tpu.matmul %0, %1, %cst {dimension_numbers = #tpu.dot_dimension_numbers<[1], [0], [0], [1], [0, 0, 1, 1], [], []>} : vector<8x16xbf16>, vector<16x128xbf16>, vector<8x128xf32> -> vector<8x128xf32>
    %c0_3 = arith.constant 0 : index
    %c0_4 = arith.constant 0 : index
    %3 = vector.load %arg3[%c0_3, %c0_4] : memref<1x128xf32, #tpu.memory_space<vmem>>, vector<1x128xf32>
    %4 = vector.broadcast %3 : vector<1x128xf32> to vector<8x128xf32>
    %5 = arith.addf %2, %4 : vector<8x128xf32>
    %cst_5 = arith.constant 0.000000e+00 : f32
    %6 = vector.broadcast %cst_5 : f32 to vector<8x128xf32>
    %7 = arith.maximumf %5, %6 : vector<8x128xf32>
    %8 = arith.truncf %7 : vector<8x128xf32> to vector<8x128xbf16>
    %c0_6 = arith.constant 0 : index
    %c0_7 = arith.constant 0 : index
    %9 = vector.load %arg4[%c0_6, %c0_7] : memref<128x128xbf16, #tpu.memory_space<vmem>>, vector<128x128xbf16>
    %cst_8 = arith.constant dense<0.000000e+00> : vector<8x128xf32>
    %10 = tpu.matmul %8, %9, %cst_8 {dimension_numbers = #tpu.dot_dimension_numbers<[1], [0], [0], [1], [0, 0, 1, 1], [], []>} : vector<8x128xbf16>, vector<128x128xbf16>, vector<8x128xf32> -> vector<8x128xf32>
    %c0_9 = arith.constant 0 : index
    %c0_10 = arith.constant 0 : index
    %11 = vector.load %arg5[%c0_9, %c0_10] : memref<1x128xf32, #tpu.memory_space<vmem>>, vector<1x128xf32>
    %12 = vector.broadcast %11 : vector<1x128xf32> to vector<8x128xf32>
    %13 = arith.addf %10, %12 : vector<8x128xf32>
    %14 = arith.truncf %13 : vector<8x128xf32> to vector<8x128xbf16>
    %c0_11 = arith.constant 0 : index
    %c0_12 = arith.constant 0 : index
    %15 = vector.load %arg6[%c0_11, %c0_12] : memref<8x128xbf16, #tpu.memory_space<vmem>>, vector<8x128xbf16>
    tpu.vector_store %arg6[%c0_11, %c0_12], %14 {strides = array<i32>} : memref<8x128xbf16, #tpu.memory_space<vmem>>, vector<8x128xbf16>,
    return
  }
  func.func @transform_0(%arg0: i32) -> (i32, i32) {
    %c0_i32 = arith.constant 0 : i32
    %c0_i32_0 = arith.constant 0 : i32
    return %arg0, %c0_i32 : i32, i32
  }
  func.func @transform_1(%arg0: i32) -> (i32, i32) {
    %c0_i32 = arith.constant 0 : i32
    %c0_i32_0 = arith.constant 0 : i32
    %c0_i32_1 = arith.constant 0 : i32
    return %c0_i32, %c0_i32_0 : i32, i32
  }
  func.func @transform_2(%arg0: i32) -> (i32, i32) {
    %c0_i32 = arith.constant 0 : i32
    %c0_i32_0 = arith.constant 0 : i32
    %c0_i32_1 = arith.constant 0 : i32
    return %c0_i32, %c0_i32_0 : i32, i32
  }
  func.func @transform_3(%arg0: i32) -> (i32, i32) {
    %c0_i32 = arith.constant 0 : i32
    %c0_i32_0 = arith.constant 0 : i32
    %c0_i32_1 = arith.constant 0 : i32
    return %c0_i32, %c0_i32_0 : i32, i32
  }
  func.func @transform_4(%arg0: i32) -> (i32, i32) {
    %c0_i32 = arith.constant 0 : i32
    %c0_i32_0 = arith.constant 0 : i32
    %c0_i32_1 = arith.constant 0 : i32
    return %c0_i32, %c0_i32_0 : i32, i32
  }
  func.func @transform_5(%arg0: i32) -> (i32, i32) {
    %c0_i32 = arith.constant 0 : i32
    %c0_i32_0 = arith.constant 0 : i32
    return %arg0, %c0_i32 : i32, i32
  }
}

</mosaic_0001>

<bundles_post_ra>
// kernel: tpu_custom_call.1
= control target key start
LH: loop header
LB: loop body
LE: loop exit
PB: predicated region body
PF: predicated region fallthrough
CT: control target
= control target key end

     0   :  { %10 = vsyncpa [#allocation3], 0  ;;  %s460_s0 = inlined_call_operand.hbm [shape: bf16[8,16], index: 0, kind: input, shape index: {}]   ;;  %s461_s1 = inlined_call_operand.hbm [shape: bf16[16,128], index: 1, kind: input, shape index: {}]   ;;  %s462_s2 = inlined_call_operand.vmem [shape: f32[1,128], index: 2, kind: input, shape index: {}]   ;;  %s463_s3 = inlined_call_operand.hbm [shape: bf16[128,128], index: 3, kind: input, shape index: {}]   ;;  %s464_s4 = inlined_call_operand.vmem [shape: f32[1,128], index: 4, kind: input, shape index: {}]   ;;  %s465_s5 = inlined_call_operand.hbm [shape: bf16[8,128], index: 5, kind: output, shape index: {}]  }
   0x1   :  { %11 = vsyncpa [#allocation6], 0 }
   0x2   :  { %12 = vsyncpa [#allocation4], 0  ;;  %s404_s18 = smov [#allocation5]  }
   0x3   :  { %s28_s19 = sshll.u32 %s404_s18, 4  ;;  %s29_s19 = int_to_ptr.vmem [resolvable:$true] %s28_s19 }
   0x4   :  { %s326_s20 = scalar_lea.vmem %s29_s19, 128  ;;  %p331_p1 = scmp.lt.s32.totalorder %s29_s19, %s29_s19 }
   0x5   :  { %p327_p0 = scmp.ne.s32.totalorder %s29_s19, %s326_s20  ;;  %p332_p2 = scmp.lt.s32.totalorder %s326_s20, %s326_s20 }
   0x7   :  { %p333_p3 = por %p332_p2, %p331_p1 }
   0x9   :  { %p334_p4 = pnand %p333_p3, %p327_p0 }
   0xb   :  { %337 = shalt.err (!%p334_p4)
}
   0xc   :  { %s405_s21 = smov 64   ;;  %s406_s22 = smov 4  }
   0xd   :  { %34 = dma.hbm_to_vmem [thread:$0]  %s461_s1, 128, %s29_s19, [#allocation6], %s405_s21, %s405_s21, %s406_s22  }
   0xe   :  { %s407_s25 = smov [#allocation2]   ;;  %s408_s27 = smov [#allocation7]  }
   0xf   :  { %s19_s26 = sshll.u32 %s407_s25, 4  ;;  %s42_s28 = sshll.u32 %s408_s27, 4  ;;  %s20_s26 = int_to_ptr.vmem [resolvable:$true] %s19_s26  ;;  %s43_s28 = int_to_ptr.vmem [resolvable:$true] %s42_s28 }
  0x10   :  { %s346_s29 = scalar_lea.vmem %s20_s26, 64  ;;  %p351_p6 = scmp.lt.s32.totalorder %s20_s26, %s20_s26 }
  0x11   :  { %p347_p5 = scmp.ne.s32.totalorder %s20_s26, %s346_s29  ;;  %p352_p7 = scmp.lt.s32.totalorder %s346_s29, %s346_s29 }
  0x13   :  { %p353_p8 = por %p352_p7, %p351_p6 }
  0x15   :  { %p354_p9 = pnand %p353_p8, %p347_p5 }
  0x17   :  { %357 = shalt.err (!%p354_p9)
}
  0x18   :  { %22 = dma.hbm_to_vmem [thread:$0]  %s460_s0, 64, %s20_s26, [#allocation3]  }
  0x19   :  { %s366_s7 = scalar_lea.vmem %s43_s28, 1024  ;;  %p371_p11 = scmp.lt.s32.totalorder %s43_s28, %s43_s28 }
  0x1a   :  { %p367_p10 = scmp.ne.s32.totalorder %s43_s28, %s366_s7  ;;  %p372_p12 = scmp.lt.s32.totalorder %s366_s7, %s366_s7 }
  0x1c   :  { %p373_p13 = por %p372_p12, %p371_p11 }
  0x1e   :  { %p374_p0 = pnand %p373_p13, %p367_p10 }
  0x20   :  { %377 = shalt.err (!%p374_p0)
}
  0x21   :  { %48 = dma.hbm_to_vmem [thread:$0]  %s463_s3, 1024, %s43_s28, [#allocation6], %s405_s21, %s405_s21, %s406_s22  }
  0x22   :  { %398 = dma.done.wait [#allocation3], 64  }
  0x23   :  { %399 = vsyncadd [#allocation3], 4294967232 }
  0x24   :  { %400 = dma.done.wait [#allocation6], 1152  }
  0x25   :  { %401 = vsyncadd [#allocation6], 4294966144  ;;  %v409_v0 = vmov 0.0   ;;  %vm410_vm0 = vmmov 0   ;;  %v309_v1 = vld [vmem:[#allocation5] sm:$0xff]   ;;  %vm77_vm1 = vcmask 130048  }
  0x26   :  { %275 = vmatprep.subr.bf16.mxu0 %v409_v0  ;;  %277 = vmatprep.mubr.msk.bf16.mxu0 %vm410_vm0, %v409_v0  ;;  %v61_v2 = vld [vmem:[#allocation2] sm:$0xf]  ;;  %v310_v3 = vld [vmem:[#allocation7 + $0x38] sm:$0xff]   ;;  %v312_v5 = vld [vmem:[#allocation7 + $0x28] sm:$0xff]   ;;  %s411_s11 = smov [#allocation8]  }
  0x27   :  { %281 = vmatprep.subr.bf16.mxu1 %v409_v0  ;;  %297 = vmatprep.mubr.msk.bf16.mxu1 %vm410_vm0, %v409_v0  ;;  %v311_v4 = vld [vmem:[#allocation7 + $0x30] sm:$0xff]   ;;  %v313_v6 = vld [vmem:[#allocation7 + $0x20] sm:$0xff]   ;;  %v314_v7 = vld [vmem:[#allocation7 + $0x18] sm:$0xff]   ;;  %s242_s12 = sshll.u32 %s411_s11, 4  ;;  %s243_s12 = int_to_ptr.vmem [resolvable:$true] %s242_s12 }
  0x28   :  { %276 = vmatpush3.bf16.msra.mxu0 %v309_v1  ;;  %282 = vmatpush3.bf16.msra.mxu1 %v310_v3  ;;  %v315_v8 = vld [vmem:[#allocation7 + $0x10] sm:$0xff]   ;;  %v316_v9 = vld [vmem:[#allocation7 + $0x8] sm:$0xff]   ;;  %v317_v10 = vld [vmem:[#allocation7] sm:$0xff]   ;;  %p383_p2 = scmp.lt.s32.totalorder %s243_s12, %s243_s12 }
  0x29   :  { %283 = vmatprep.subr.bf16.mxu1 %v409_v0  ;;  %v252_v11 = vld [vmem:[%s462_s2] ss:$0 sm:$0xff]  ;;  %s378_s2 = scalar_lea.vmem %s243_s12, 64 }
  0x2a   :  { %v255_v19 = vld [vmem:[%s464_s4] ss:$0 sm:$0xff]  ;;  %p379_p1 = scmp.ne.s32.totalorder %s243_s12, %s378_s2  ;;  %p384_p3 = scmp.lt.s32.totalorder %s378_s2, %s378_s2 }
  0x2b   :  { %278 = vmatmul.mubr.msk.bf16.vlgmr.msra.gmra.mxu0 %vm77_vm1, %v61_v2 }
  0x2c   :  { %284 = vmatpush3.bf16.msra.mxu1 %v311_v4  ;;  %p385_p4 = por %p384_p3, %p383_p2 }
  0x2d   :  { %285 = vmatprep.subr.bf16.mxu1 %v409_v0 }
  0x2e   :  { %p386_p5 = pnand %p385_p4, %p379_p1 }
  0x30   :  { %286 = vmatpush3.bf16.msra.mxu1 %v312_v5 }
  0x31   :  { %287 = vmatprep.subr.bf16.mxu1 %v409_v0 }
  0x34   :  { %288 = vmatpush3.bf16.msra.mxu1 %v313_v6 }
  0x35   :  { %289 = vmatprep.subr.bf16.mxu1 %v409_v0 }
  0x38   :  { %290 = vmatpush3.bf16.msra.mxu1 %v314_v7 }
  0x39   :  { %291 = vmatprep.subr.bf16.mxu1 %v409_v0 }
  0x3c   :  { %292 = vmatpush3.bf16.msra.mxu1 %v315_v8 }
  0x3d   :  { %293 = vmatprep.subr.bf16.mxu1 %v409_v0 }
  0x40   :  { %294 = vmatpush3.bf16.msra.mxu1 %v316_v9 }
  0x41   :  { %295 = vmatprep.subr.bf16.mxu1 %v409_v0 }
  0x44   :  { %296 = vmatpush3.bf16.msra.mxu1 %v317_v10 }
  0xeb   :  { %v115_v12 = vpop.f32.mrf.mxu0 }
  0xec   :  { %v116_v13 = vadd.f32 %v252_v11, %v115_v12 }
  0xed   :  { %v279_v14 = vpop.f32.mrf.mxu0 }
  0xee   :  { %v121_v15 = vmax.f32 %v116_v13, 0.0 }
  0xef   :  { %v118_v16 = vpop.f32.mrf.mxu0 }
  0xf0   :  { %v122_v17 = vpack.c.bf16 %v121_v15, %v121_v15 }
  0xf1   :  { %v280_v18 = vpop.f32.mrf.mxu0 }
  0xf2   :  { %298 = vmatmul.mubr.bf16.vlgmr.msra.gmra.mxu1 %v122_v17 }
 0x1b2   :  { %v228_v20 = vpop.f32.mrf.mxu1 }
 0x1b3   :  { %v229_v21 = vadd.f32 %v255_v19, %v228_v20 }
 0x1b4   :  { %v299_v22 = vpop.f32.mrf.mxu1 }
 0x1b5   :  { %v234_v23 = vpack.c.bf16 %v229_v21, %v229_v21 }
 0x1b6   :  { %v231_v24 = vpop.f32.mrf.mxu1 }
 0x1b7   :  { %235 = vst [vmem:[#allocation8] sm:$0xf] %v234_v23 }
 0x1b8   :  { %v300_v25 = vpop.f32.mrf.mxu1 }
 0x1b9   :  { %389 = shalt.err (!%p386_p5)
}
 0x1ba   :  { %245 = dma.vmem_to_hbm [thread:$0]  %s243_s12, 64, %s465_s5, [#allocation4]  }
 0x1bb   :  { %402 = dma.done.wait [#allocation4], 64  }
 0x1bc   :  { %403 = vsyncadd [#allocation4], 4294967232 }
 0x1bd   :  { %249 = vsyncpa [#allocation3], 1 }
 0x1be   :  { %250 = vsyncpa [#allocation6], 1 }
 0x1bf   :  { %251 = vsyncpa [#allocation4], 1 }

</bundles_post_ra>
